<compile_context>
chip_gen: v6e
topology: v6e:2x2x1
jax: 0.10.0
libtpu: 0.0.40
codegen_flags: <defaults>
</compile_context>

<pallas_src>
import jax
import jax.numpy as jnp
from jax.experimental import pallas as pl
from jax.experimental.pallas import tpu as pltpu


STATE_SPACE = 4      # CartPole-v1 observation_space.shape[0]
ACTION_SPACE = 2     # CartPole-v1 action_space.n
HIDDEN = 128

# Row layout of the packed (8, HIDDEN) params tile.
_ROW_W1 = 0                       # rows 0..3   : w1  (STATE_SPACE, HIDDEN)
_ROW_B1 = STATE_SPACE             # row 4       : b1  (1, HIDDEN)
_ROW_W2D = STATE_SPACE + 1        # row 5       : w2[:,1]-w2[:,0]  (1, HIDDEN)
_ROW_B2D = STATE_SPACE + 2        # row 6       : b2[1]-b2[0] broadcast across lanes
_PARAM_ROWS = 8                   # row 7       : zero padding (keeps an (8,128) tile)

_SMALL_BATCH_MAX = 256            # above this, h (B,128) spills vregs -> use grid path


def _log_softmax_pair(d, batch):
    """log_softmax([s0, s1]) given d = s1 - s0, as [-softplus(d), d - softplus(d)]."""
    sp = jnp.maximum(d, 0.0) + jnp.log(1.0 + jnp.exp(-jnp.abs(d)))   # stable softplus(d)
    iota = jax.lax.broadcasted_iota(jnp.int32, (batch, ACTION_SPACE), 1).astype(jnp.float32)
    return d * iota - sp          # col 0: -sp ; col 1: d - sp


def policy_kernel_small(x_ref, p_ref, out_ref):
    # x_ref: (B, 4)   p_ref: (8, 128)   out_ref: (B, 2)
    x = x_ref[...]
    w1 = p_ref[_ROW_W1:_ROW_W1 + STATE_SPACE, :]
    b1 = p_ref[_ROW_B1:_ROW_B1 + 1, :]
    w2d = p_ref[_ROW_W2D:_ROW_W2D + 1, :]
    b2d = p_ref[_ROW_B2D:_ROW_B2D + 1, 0:1]

    # affine1 as K=4 unrolled broadcast MACs on the VPU (MXU would be <1% utilized).
    h = b1 + x[:, 0:1] * w1[0:1, :]
    for k in range(1, STATE_SPACE):
        h = h + x[:, k:k + 1] * w1[k:k + 1, :]

    # dropout (eval mode -> identity), then ReLU.
    h = jnp.maximum(h, 0.0)

    # 2-class head: logit difference via fused weight column (VPU mul + XLU lane reduce).
    d = jnp.sum(h * w2d, axis=1, keepdims=True) + b2d                 # (B, 1)

    out_ref[...] = _log_softmax_pair(d, x.shape[0])


def policy_kernel_large(x_ref, p_ref, out_ref):
    # x_ref: (TB, 4)   p_ref: (8, 128)   out_ref: (TB, 2)
    x = x_ref[...]
    w1 = p_ref[_ROW_W1:_ROW_W1 + STATE_SPACE, :]
    b1 = p_ref[_ROW_B1:_ROW_B1 + 1, :]
    w2d = p_ref[_ROW_W2D:_ROW_W2D + 1, :]
    b2d = p_ref[_ROW_B2D:_ROW_B2D + 1, 0:1]

    # affine1 on the MXU for rollout-scale batches.
    h = jnp.dot(x, w1, preferred_element_type=jnp.float32) + b1
    h = jnp.maximum(h, 0.0)                                           # dropout eval = identity

    d = jnp.sum(h * w2d, axis=1, keepdims=True) + b2d                 # (TB, 1)
    out_ref[...] = _log_softmax_pair(d, x.shape[0])


def pack_params(w1, b1, w2, b2):
    """Fuse the 2-column head and pack every constant into one (8, 128) f32 tile.

    Done once at init time so per-call there are zero extra XLA ops before the kernel.
    """
    w2d = (w2[:, 1] - w2[:, 0]).reshape(1, HIDDEN)
    b2f = b2.reshape(-1)
    b2d_row = jnp.full((1, HIDDEN), b2f[1] - b2f[0], jnp.float32)
    pad = jnp.zeros((_PARAM_ROWS - (STATE_SPACE + 3), HIDDEN), jnp.float32)
    return jnp.concatenate(
        [w1, b1.reshape(1, HIDDEN), w2d, b2d_row, pad], axis=0
    ).astype(jnp.float32)                                             # (8, 128)


def policy_forward(x, params, *, block_b=512):
    """x: (B, 4) f32, params: packed (8, 128) f32 -> (B, 2) log-probs."""
    B = x.shape[0]

    if B <= _SMALL_BATCH_MAX:
        # Latency path: no grid, 2 input DMAs + 1 output DMA, all-VPU math.
        vmem_spec = pl.BlockSpec(memory_space=pltpu.MemorySpace.VMEM)
        return pl.pallas_call(
            policy_kernel_small,
            out_shape=jax.ShapeDtypeStruct((B, ACTION_SPACE), jnp.float32),
            in_specs=[vmem_spec, vmem_spec],
            out_specs=vmem_spec,
        )(x, params)

    # Throughput path: tile over B, weights resident, MXU matmul, parallel on v7x.
    nb = pl.cdiv(B, block_b)
    Bp = nb * block_b
    if Bp != B:
        x = jnp.pad(x, ((0, Bp - B), (0, 0)))
    out = pl.pallas_call(
        policy_kernel_large,
        out_shape=jax.ShapeDtypeStruct((Bp, ACTION_SPACE), jnp.float32),
        grid=(nb,),
        in_specs=[
            pl.BlockSpec((block_b, STATE_SPACE), lambda i: (i, 0)),
            pl.BlockSpec((_PARAM_ROWS, HIDDEN), lambda i: (0, 0)),
        ],
        out_specs=pl.BlockSpec((block_b, ACTION_SPACE), lambda i: (i, 0)),
        compiler_params=pltpu.CompilerParams(dimension_semantics=("parallel",)),
    )(x, params)
    return out[:B]


def init_params(key):
    """Deterministic init mirroring nn.Linear's uniform(-1/sqrt(fan_in), 1/sqrt(fan_in))."""
    k1, k2, k3, k4 = jax.random.split(key, 4)
    bound1 = 1.0 / jnp.sqrt(jnp.float32(STATE_SPACE))
    bound2 = 1.0 / jnp.sqrt(jnp.float32(HIDDEN))
    # stored as [in, out] (transpose of PyTorch [out, in])
    w1 = jax.random.uniform(k1, (STATE_SPACE, HIDDEN), jnp.float32, -bound1, bound1)
    b1 = jax.random.uniform(k2, (1, HIDDEN), jnp.float32, -bound1, bound1)
    w2 = jax.random.uniform(k3, (HIDDEN, ACTION_SPACE), jnp.float32, -bound2, bound2)
    b2 = jax.random.uniform(k4, (1, ACTION_SPACE), jnp.float32, -bound2, bound2)
    return w1, b1, w2, b2


def _reference(x, w1, b1, w2, b2):
    h = jnp.maximum(x @ w1 + b1, 0.0)
    return jax.nn.log_softmax(h @ w2 + b2, axis=1)


if __name__ == "__main__":
    key = jax.random.PRNGKey(0)
    k_params, k_x_small, k_x_large = jax.random.split(key, 3)

    w1, b1, w2, b2 = init_params(k_params)
    params = pack_params(w1, b1, w2, b2)          # packed once, reused every call

    # --- small-batch latency path: batch of 8 CartPole states, shape [8, 4] ---
    x = jax.random.normal(k_x_small, (8, STATE_SPACE), jnp.float32)
    log_probs = jax.block_until_ready(policy_forward(x, params))
    assert log_probs.shape == (8, ACTION_SPACE)
    assert jnp.allclose(log_probs, _reference(x, w1, b1, w2, b2), atol=1e-5, rtol=1e-5)

    # --- large-batch grid path (rollout-scale scoring), incl. a ragged batch ---
    xl = jax.random.normal(k_x_large, (1000, STATE_SPACE), jnp.float32)
    log_probs_l = jax.block_until_ready(policy_forward(xl, params))
    assert log_probs_l.shape == (1000, ACTION_SPACE)
    assert jnp.allclose(log_probs_l, _reference(xl, w1, b1, w2, b2), atol=1e-5, rtol=1e-5)

    print("KERNEL_OK")
</pallas_src>

<mosaic_0001>
module attributes {stable_mosaic.version = 11 : i64} {
  func.func @policy_kernel_small(%arg0: memref<8x4xf32, #tpu.memory_space<vmem>>, %arg1: memref<8x128xf32, #tpu.memory_space<vmem>>, %arg2: memref<8x2xf32, #tpu.memory_space<vmem>>) attributes {dimension_semantics = [], scalar_prefetch = 0 : i64, scratch_operands = 0 : i64, tpu.core_type = #tpu.core_type<tc>} {
    %c0 = arith.constant 0 : index
    %c0_0 = arith.constant 0 : index
    %0 = vector.load %arg0[%c0, %c0_0] : memref<8x4xf32, #tpu.memory_space<vmem>>, vector<8x4xf32>
    %c0_1 = arith.constant 0 : index
    %c0_2 = arith.constant 0 : index
    %1 = vector.load %arg1[%c0_1, %c0_2] : memref<8x128xf32, #tpu.memory_space<vmem>>, vector<4x128xf32>
    %c4 = arith.constant 4 : index
    %c0_3 = arith.constant 0 : index
    %2 = vector.load %arg1[%c4, %c0_3] : memref<8x128xf32, #tpu.memory_space<vmem>>, vector<1x128xf32>
    %c5 = arith.constant 5 : index
    %c0_4 = arith.constant 0 : index
    %3 = vector.load %arg1[%c5, %c0_4] : memref<8x128xf32, #tpu.memory_space<vmem>>, vector<1x128xf32>
    %c6 = arith.constant 6 : index
    %c0_5 = arith.constant 0 : index
    %4 = vector.load %arg1[%c6, %c0_5] : memref<8x128xf32, #tpu.memory_space<vmem>>, vector<1x1xf32>
    %5 = vector.extract_strided_slice %0 {offsets = [0, 0], sizes = [8, 1], strides = [1, 1]} : vector<8x4xf32> to vector<8x1xf32>
    %6 = vector.extract_strided_slice %1 {offsets = [0, 0], sizes = [1, 128], strides = [1, 1]} : vector<4x128xf32> to vector<1x128xf32>
    %7 = vector.broadcast %5 : vector<8x1xf32> to vector<8x128xf32>
    %8 = vector.broadcast %6 : vector<1x128xf32> to vector<8x128xf32>
    %9 = arith.mulf %7, %8 : vector<8x128xf32>
    %10 = vector.broadcast %2 : vector<1x128xf32> to vector<8x128xf32>
    %11 = arith.addf %10, %9 : vector<8x128xf32>
    %12 = vector.extract_strided_slice %0 {offsets = [0, 1], sizes = [8, 1], strides = [1, 1]} : vector<8x4xf32> to vector<8x1xf32>
    %13 = vector.extract_strided_slice %1 {offsets = [1, 0], sizes = [1, 128], strides = [1, 1]} : vector<4x128xf32> to vector<1x128xf32>
    %14 = vector.broadcast %12 : vector<8x1xf32> to vector<8x128xf32>
    %15 = vector.broadcast %13 : vector<1x128xf32> to vector<8x128xf32>
    %16 = arith.mulf %14, %15 : vector<8x128xf32>
    %17 = arith.addf %11, %16 : vector<8x128xf32>
    %18 = vector.extract_strided_slice %0 {offsets = [0, 2], sizes = [8, 1], strides = [1, 1]} : vector<8x4xf32> to vector<8x1xf32>
    %19 = vector.extract_strided_slice %1 {offsets = [2, 0], sizes = [1, 128], strides = [1, 1]} : vector<4x128xf32> to vector<1x128xf32>
    %20 = vector.broadcast %18 : vector<8x1xf32> to vector<8x128xf32>
    %21 = vector.broadcast %19 : vector<1x128xf32> to vector<8x128xf32>
    %22 = arith.mulf %20, %21 : vector<8x128xf32>
    %23 = arith.addf %17, %22 : vector<8x128xf32>
    %24 = vector.extract_strided_slice %0 {offsets = [0, 3], sizes = [8, 1], strides = [1, 1]} : vector<8x4xf32> to vector<8x1xf32>
    %25 = vector.extract_strided_slice %1 {offsets = [3, 0], sizes = [1, 128], strides = [1, 1]} : vector<4x128xf32> to vector<1x128xf32>
    %26 = vector.broadcast %24 : vector<8x1xf32> to vector<8x128xf32>
    %27 = vector.broadcast %25 : vector<1x128xf32> to vector<8x128xf32>
    %28 = arith.mulf %26, %27 : vector<8x128xf32>
    %29 = arith.addf %23, %28 : vector<8x128xf32>
    %cst = arith.constant 0.000000e+00 : f32
    %30 = vector.broadcast %cst : f32 to vector<8x128xf32>
    %31 = arith.maximumf %29, %30 : vector<8x128xf32>
    %32 = vector.broadcast %3 : vector<1x128xf32> to vector<8x128xf32>
    %33 = arith.mulf %31, %32 : vector<8x128xf32>
    %cst_6 = arith.constant dense<0.000000e+00> : vector<8xf32>
    %34 = vector.multi_reduction <add>, %33, %cst_6 [1] : vector<8x128xf32> to vector<8xf32>
    %35 = vector.shape_cast %34 : vector<8xf32> to vector<8x1xf32>
    %36 = vector.broadcast %4 : vector<1x1xf32> to vector<8x1xf32>
    %37 = arith.addf %35, %36 : vector<8x1xf32>
    %cst_7 = arith.constant 0.000000e+00 : f32
    %38 = vector.broadcast %cst_7 : f32 to vector<8x1xf32>
    %39 = arith.maximumf %37, %38 : vector<8x1xf32>
    %40 = math.absf %37 : vector<8x1xf32>
    %cst_8 = arith.constant 0.000000e+00 : f32
    %41 = vector.broadcast %cst_8 : f32 to vector<8x1xf32>
    %42 = arith.subf %41, %40 : vector<8x1xf32>
    %43 = math.exp %42 : vector<8x1xf32>
    %cst_9 = arith.constant 1.000000e+00 : f32
    %44 = vector.broadcast %cst_9 : f32 to vector<8x1xf32>
    %45 = arith.addf %44, %43 : vector<8x1xf32>
    %46 = math.log %45 : vector<8x1xf32>
    %47 = arith.addf %39, %46 : vector<8x1xf32>
    %48 = tpu.iota {dimensions = array<i32: 1>} : vector<8x2xi32>
    %49 = arith.sitofp %48 : vector<8x2xi32> to vector<8x2xf32>
    %50 = vector.broadcast %37 : vector<8x1xf32> to vector<8x2xf32>
    %51 = arith.mulf %50, %49 : vector<8x2xf32>
    %52 = vector.broadcast %47 : vector<8x1xf32> to vector<8x2xf32>
    %53 = arith.subf %51, %52 : vector<8x2xf32>
    %c0_10 = arith.constant 0 : index
    %c0_11 = arith.constant 0 : index
    %54 = vector.load %arg2[%c0_10, %c0_11] : memref<8x2xf32, #tpu.memory_space<vmem>>, vector<8x2xf32>
    tpu.vector_store %arg2[%c0_10, %c0_11], %53 {strides = array<i32>} : memref<8x2xf32, #tpu.memory_space<vmem>>, vector<8x2xf32>,
    return
  }
}

</mosaic_0001>

<bundles_post_ra>
// kernel: tpu_custom_call.1
= control target key start
LH: loop header
LB: loop body
LE: loop exit
PB: predicated region body
PF: predicated region fallthrough
CT: control target
= control target key end

     0   :  { %v120_v0 = vmov 0   ;;  %v121_v2 = vmov 2   ;;  %v122_v3 = vmov 1   ;;  %v123_v4 = vmov 3   ;;  %s157_s0 = inlined_call_operand.vmem [shape: f32[8,4], index: 0, kind: input, shape index: {}]   ;;  %s158_s1 = inlined_call_operand.vmem [shape: f32[8,128], index: 1, kind: input, shape index: {}]   ;;  %s159_s2 = inlined_call_operand.vmem [shape: f32[8,2], index: 2, kind: output, shape index: {}]  }
   0x1   :  { %111 = vset.pattern.permute.xlu0 %v120_v0  ;;  %v11_v1 = vld [vmem:[%s157_s0] sm:$0xff]  ;;  %113 = vset.pattern.permute.xlu1 %v121_v2  ;;  %v21_v5 = vlaneseq  ;;  %vm98_vm0 = vcmask 15360  }
   0x2   :  { %18 = vperm.xlu0 %111, %v11_v1   ;;  %42 = vperm.xlu1 %113, %v11_v1   ;;  %v12_v8 = vld [vmem:[%s158_s1] sm:$0xf]  ;;  %v104_v17 = vld [vmem:[%s158_s1 + $0x4] ss:$0 sm:$0xff]  ;;  %v105_v29 = vld [vmem:[%s158_s1 + $0x5] ss:$0 sm:$0xff] }
   0x3   :  { %v22_v6 = vshrl.u32 %v21_v5, 7  ;;  %v106_v32 = vld [vmem:[%s158_s1 + $0x6] ss:$0 sm:$0xff]  ;;  %v84_v44 = vand.u32 127, %v21_v5 }
   0x5   :  { %v23_v7 = vsub.s32 0, %v22_v6  ;;  %v37_v10 = vsub.s32 1, %v22_v6  ;;  %v47_v12 = vsub.s32 2, %v22_v6  ;;  %v57_v14 = vsub.s32 3, %v22_v6 }
   0x6   :  { %112 = vset.pattern.permute.xlu0 %v122_v3  ;;  %114 = vset.pattern.permute.xlu1 %v123_v4  ;;  %v85_v45 = vcvt.s32.f32 %v84_v44 }
   0x7   :  { %32 = vperm.xlu0 %112, %v11_v1   ;;  %52 = vperm.xlu1 %114, %v11_v1   ;;  %v24_v9 = vrot.slane %v12_v8, %v23_v7  ;;  %v38_v16 = vrot.slane %v12_v8, %v37_v10  ;;  %v48_v18 = vrot.slane %v12_v8, %v47_v12 }
   0x8   :  { %v58_v19 = vrot.slane %v12_v8, %v57_v14 }
   0xb   :  { %115 = vset.pattern.permute.xlu0 %v120_v0 }
  0x7d   :  { %v19_v11 = vpop.permute.xlu0 %18  ;;  %v43_v13 = vpop.permute.xlu1 %42 }
  0x7e   :  { %v25_v15 = vmul.f32 %v24_v9, %v19_v11  ;;  %v49_v24 = vmul.f32 %v48_v18, %v43_v13 }
  0x80   :  { %v30_v22 = vadd.f32 %v104_v17, %v25_v15 }
  0x82   :  { %v33_v20 = vpop.permute.xlu0 %32  ;;  %v53_v21 = vpop.permute.xlu1 %52 }
  0x83   :  { %v39_v23 = vmul.f32 %v38_v16, %v33_v20  ;;  %v59_v26 = vmul.f32 %v58_v19, %v53_v21 }
  0x85   :  { %v40_v25 = vadd.f32 %v39_v23, %v30_v22 }
  0x87   :  { %v50_v27 = vadd.f32 %v49_v24, %v40_v25 }
  0x89   :  { %v60_v28 = vadd.f32 %v59_v26, %v50_v27 }
  0x8b   :  { %v61_v30 = vmax.f32 %v60_v28, 0.0 }
  0x8d   :  { %v66_v31 = vmul.f32 %v105_v29, %v61_v30 }
  0x8f   :  { %67 = vadd.xlane.f32.xlu1 %v66_v31 }
 0x118   :  { %v68_v33 = vpop.xlane.xlu1 %67 }
 0x119   :  { %v73_v34 = vadd.f32 %v106_v32, %v68_v33 }
 0x11b   :  { %v75_v35 = vand.u32 2147483647, %v73_v34  ;;  %88 = vperm.xlu0 %115, %v73_v34   ;;  %v74_v41 = vmax.f32 %v73_v34, 0.0 }
 0x11d   :  { %v76_v36 = vsub.f32 0.0, %v75_v35 }
 0x11f   :  { %v77_v37 = vmul.f32 1.442695, %v76_v36 }
 0x121   :  { %116 = vpow2.f32 %v77_v37 }
 0x12e   :  { %v117_v38 = vpop.eup %116 }
 0x12f   :  { %v79_v39 = vadd.f32 1.0, %v117_v38 }
 0x131   :  { %118 = vlog2.f32 %v79_v39 }
 0x13e   :  { %v119_v40 = vpop.eup %118 }
 0x13f   :  { %v81_v42 = vmul.f32 0.6931472, %v119_v40 }
 0x141   :  { %v82_v43 = vadd.f32 %v81_v42, %v74_v41 }
 0x143   :  { %94 = vperm.xlu0 %115, %v82_v43  }
 0x196   :  { %v89_v46 = vpop.permute.xlu0 %88 }
 0x197   :  { %v91_v47 = vmul.f32 %v89_v46, %v85_v45 }
 0x1be   :  { %v95_v48 = vpop.permute.xlu0 %94 }
 0x1bf   :  { %v97_v49 = vsub.f32 %v91_v47, %v95_v48 }
 0x1c1   :  { %99 = vst.msk [vmem:[%s159_s2] sm:$0xff] %vm98_vm0, %v97_v49 }

</bundles_post_ra>
